<compile_context>
chip_gen: v6e
topology: v6e:2x2x1
jax: 0.10.0
libtpu: 0.0.40
codegen_flags: <defaults>
</compile_context>

<pallas_src>
import functools

import jax
import jax.numpy as jnp
from jax import lax
from jax.experimental import pallas as pl
from jax.experimental.pallas import tpu as pltpu

BN_EPS = 1e-5
LANE = 128
IN_DIM, H1_DIM, LATENT_DIM, OUT_DIM = 88, 70, 54, 88
NUM_STAGES = 4  # linear1 | bn1+relu+linear2 | bn2+relu+linear3 | bn3+relu+proj


def _round_up(x, m):
    return ((x + m - 1) // m) * m


def autoencoder_kernel(
    x_ref, w_ref, vec_ref,              # inputs
    out_ref, z_ref,                     # outputs
    h1_scr, h2_scr, h3_scr, a2_scr,     # whole-batch activations (VMEM resident)
    stats_scr,                          # (8,128): rows 2l / 2l+1 = sum / sumsq of layer l
    *, true_b, tile_b, b_pad,
):
    s = pl.program_id(0)                # stage
    t = pl.program_id(1)                # batch tile
    row0 = pl.multiple_of(t * tile_b, 8)
    inv_b = 1.0 / float(true_b)

    def bn_coeffs(layer):
        # Fused affine: y = h * scale + shift  (single FMA per element).
        ssum = stats_scr[2 * layer:2 * layer + 1, :]
        ssq = stats_scr[2 * layer + 1:2 * layer + 2, :]
        mean = ssum * inv_b
        var = ssq * inv_b - mean * mean           # single-pass biased variance
        gamma = vec_ref[layer:layer + 1, :]
        beta = vec_ref[3 + layer:4 + layer, :]
        scale = gamma * lax.rsqrt(var + BN_EPS)   # EUP rsqrt
        shift = beta - mean * scale
        return scale, shift

    def mask_pad_rows(a):
        # Zero out batch-padding rows so they never contaminate the next
        # layer's batch statistics (only emitted when padding exists).
        if b_pad == true_b:
            return a
        rows = row0 + lax.broadcasted_iota(jnp.int32, (tile_b, 1), 0)
        return a * (rows < true_b).astype(a.dtype)

    def accumulate(layer, h):
        stats_scr[2 * layer:2 * layer + 1, :] += jnp.sum(h, axis=0, keepdims=True)
        stats_scr[2 * layer + 1:2 * layer + 2, :] += jnp.sum(h * h, axis=0, keepdims=True)

    @pl.when(jnp.logical_and(s == 0, t == 0))
    def _init():
        stats_scr[...] = jnp.zeros_like(stats_scr)

    @pl.when(s == 0)
    def _stage0():  # h1 = x @ W1  (no bias: it cancels in BN)
        h1 = jnp.dot(x_ref[...], w_ref[0, :, :], preferred_element_type=jnp.float32)
        h1_scr[pl.ds(row0, tile_b), :] = h1
        accumulate(0, h1)

    @pl.when(s == 1)
    def _stage1():  # a1 = relu(bn1(h1)); h2 = a1 @ W2
        scale, shift = bn_coeffs(0)
        a1 = mask_pad_rows(
            jnp.maximum(h1_scr[pl.ds(row0, tile_b), :] * scale + shift, 0.0))
        h2 = jnp.dot(a1, w_ref[1, :, :], preferred_element_type=jnp.float32)
        h2_scr[pl.ds(row0, tile_b), :] = h2
        accumulate(1, h2)

    @pl.when(s == 2)
    def _stage2():  # a2 = z = relu(bn2(h2)); h3 = a2 @ W3
        scale, shift = bn_coeffs(1)
        a2 = mask_pad_rows(
            jnp.maximum(h2_scr[pl.ds(row0, tile_b), :] * scale + shift, 0.0))
        a2_scr[pl.ds(row0, tile_b), :] = a2
        h3 = jnp.dot(a2, w_ref[2, :, :], preferred_element_type=jnp.float32)
        h3_scr[pl.ds(row0, tile_b), :] = h3
        accumulate(2, h3)

    @pl.when(s == NUM_STAGES - 1)
    def _stage3():  # a3 = relu(bn3(h3)); out = a3 @ Wp + bp ; emit out, z
        scale, shift = bn_coeffs(2)
        a3 = jnp.maximum(h3_scr[pl.ds(row0, tile_b), :] * scale + shift, 0.0)
        out = jnp.dot(a3, w_ref[3, :, :], preferred_element_type=jnp.float32) + vec_ref[6:7, :]
        out_ref[...] = out.astype(out_ref.dtype)
        z_ref[...] = a2_scr[pl.ds(row0, tile_b), :].astype(z_ref.dtype)


def _compiler_params(vmem_limit_bytes):
    cls = getattr(pltpu, "CompilerParams", None) or getattr(pltpu, "TPUCompilerParams", None)
    if cls is None:
        return None
    for kwargs in (
        dict(dimension_semantics=("arbitrary", "arbitrary"),
             vmem_limit_bytes=int(vmem_limit_bytes)),
        dict(dimension_semantics=("arbitrary", "arbitrary")),
        dict(),
    ):
        try:
            return cls(**kwargs)
        except TypeError:
            continue
    return None


def pack_params(params):
    """Pad / pack PyTorch-shaped params once, outside the hot path."""
    def pad_w(w):
        return jnp.zeros((LANE, LANE), jnp.float32).at[:w.shape[0], :w.shape[1]].set(w)

    def pad_v(v):
        v = jnp.asarray(v, jnp.float32).reshape(-1)
        return jnp.zeros((LANE,), jnp.float32).at[:v.shape[0]].set(v)

    w_packed = jnp.stack([pad_w(params["w1"]), pad_w(params["w2"]),
                          pad_w(params["w3"]), pad_w(params["wp"])])   # (4,128,128)
    vec_packed = jnp.stack([pad_v(params["g1"]), pad_v(params["g2"]), pad_v(params["g3"]),
                            pad_v(params["be1"]), pad_v(params["be2"]), pad_v(params["be3"]),
                            pad_v(params["bp"]), jnp.zeros((LANE,), jnp.float32)])  # (8,128)
    # NOTE: b1/b2/b3 are intentionally not packed -- they cancel in BatchNorm.
    return w_packed, vec_packed


def autoencoder_forward(x, w_packed, vec_packed, *, tile_b=None):
    """x: (B, 88) float32.  Returns (reconstruction (B, 88), latent z (B, 54))."""
    B, F = x.shape
    assert F == IN_DIM
    if tile_b is None:
        tile_b = 512 if B >= 512 else _round_up(B, 8)
    tile_b = max(8, min(_round_up(tile_b, 8), _round_up(B, 8)))
    b_pad = _round_up(B, tile_b)
    num_tiles = b_pad // tile_b

    x_pad = jnp.zeros((b_pad, LANE), jnp.float32).at[:B, :F].set(x.astype(jnp.float32))

    f32 = 4
    scratch_bytes = (4 * b_pad * LANE + 8 * LANE) * f32
    block_bytes = 2 * (3 * tile_b * LANE + 4 * LANE * LANE + 8 * LANE) * f32
    vmem_limit = min(max(2 * (scratch_bytes + block_bytes), 32 * 1024 * 1024),
                     128 * 1024 * 1024)

    kernel = functools.partial(autoencoder_kernel, true_b=B, tile_b=tile_b, b_pad=b_pad)

    out_pad, z_pad = pl.pallas_call(
        kernel,
        out_shape=(
            jax.ShapeDtypeStruct((b_pad, LANE), jnp.float32),
            jax.ShapeDtypeStruct((b_pad, LANE), jnp.float32),
        ),
        grid=(NUM_STAGES, num_tiles),
        in_specs=[
            # x is only consumed in stage 0; park the index at block 0 otherwise.
            pl.BlockSpec((tile_b, LANE), lambda s, t: (jnp.where(s == 0, t, 0), 0)),
            pl.BlockSpec((4, LANE, LANE), lambda s, t: (0, 0, 0)),   # packed weights
            pl.BlockSpec((8, LANE), lambda s, t: (0, 0)),            # packed gammas/betas/bp
        ],
        out_specs=(
            # Outputs are produced only in the final stage; each block is written
            # at its last visit (flash-attention style).
            pl.BlockSpec((tile_b, LANE), lambda s, t: (jnp.where(s == NUM_STAGES - 1, t, 0), 0)),
            pl.BlockSpec((tile_b, LANE), lambda s, t: (jnp.where(s == NUM_STAGES - 1, t, 0), 0)),
        ),
        scratch_shapes=[
            pltpu.VMEM((b_pad, LANE), jnp.float32),   # h1
            pltpu.VMEM((b_pad, LANE), jnp.float32),   # h2
            pltpu.VMEM((b_pad, LANE), jnp.float32),   # h3
            pltpu.VMEM((b_pad, LANE), jnp.float32),   # a2 (= z, pre-slice)
            pltpu.VMEM((8, LANE), jnp.float32),       # sum / sumsq per BN layer
        ],
        compiler_params=_compiler_params(vmem_limit),
    )(x_pad, w_packed, vec_packed)

    return out_pad[:B, :OUT_DIM], z_pad[:B, :LATENT_DIM]


def init_params(key):
    """Deterministic parameter init (shapes from the PyTorch module's __init__)."""
    dims = [(88, 70), (70, 54), (54, 70)]
    keys = jax.random.split(key, 16)
    params = {}
    ki = 0
    for idx, (din, dout) in enumerate(dims, start=1):
        bound = 1.0 / jnp.sqrt(din)
        params[f"w{idx}"] = jax.random.uniform(
            keys[ki], (din, dout), jnp.float32, -bound, bound); ki += 1
        params[f"b{idx}"] = jax.random.uniform(
            keys[ki], (1, dout), jnp.float32, -bound, bound); ki += 1
        params[f"g{idx}"] = 1.0 + 0.1 * jax.random.normal(keys[ki], (1, dout), jnp.float32); ki += 1
        params[f"be{idx}"] = 0.1 * jax.random.normal(keys[ki], (1, dout), jnp.float32); ki += 1
    bound = 1.0 / jnp.sqrt(70.0)
    params["wp"] = jax.random.uniform(keys[ki], (70, 88), jnp.float32, -bound, bound); ki += 1
    params["bp"] = jax.random.uniform(keys[ki], (1, 88), jnp.float32, -bound, bound); ki += 1
    return params


def _reference_forward(x, p):
    """Plain-JAX reference mirroring the PyTorch module (train-mode BatchNorm1d)."""
    def block(x, w, b, g, be):
        h = x @ w + b
        m = jnp.mean(h, axis=0, keepdims=True)
        v = jnp.mean((h - m) ** 2, axis=0, keepdims=True)
        return jnp.maximum((h - m) / jnp.sqrt(v + BN_EPS) * g + be, 0.0)
    h1 = block(x, p["w1"], p["b1"], p["g1"], p["be1"])
    z = block(h1, p["w2"], p["b2"], p["g2"], p["be2"])
    h3 = block(z, p["w3"], p["b3"], p["g3"], p["be3"])
    return h3 @ p["wp"] + p["bp"], z


if __name__ == "__main__":
    key = jax.random.PRNGKey(0)
    pkey, xkey = jax.random.split(key)
    params = init_params(pkey)
    w_packed, vec_packed = pack_params(params)

    # Case 1: small batch, single tile.
    B = 8
    x = jax.random.normal(xkey, (B, IN_DIM), jnp.float32)
    out, z = autoencoder_forward(x, w_packed, vec_packed)
    out = jax.block_until_ready(out)
    z = jax.block_until_ready(z)
    ref_out, ref_z = _reference_forward(x, params)
    assert out.shape == (B, OUT_DIM) and z.shape == (B, LATENT_DIM)
    assert jnp.allclose(out, ref_out, atol=5e-4, rtol=5e-4)
    assert jnp.allclose(z, ref_z, atol=5e-4, rtol=5e-4)

    # Case 2: ragged batch over multiple pipelined tiles
    # (exercises cross-tile BN statistics + batch-padding masking).
    B2 = 20
    x2 = jax.random.normal(jax.random.PRNGKey(1), (B2, IN_DIM), jnp.float32)
    out2, z2 = autoencoder_forward(x2, w_packed, vec_packed, tile_b=8)
    out2 = jax.block_until_ready(out2)
    z2 = jax.block_until_ready(z2)
    ref_out2, ref_z2 = _reference_forward(x2, params)
    assert jnp.allclose(out2, ref_out2, atol=5e-4, rtol=5e-4)
    assert jnp.allclose(z2, ref_z2, atol=5e-4, rtol=5e-4)

    print("KERNEL_OK")
</pallas_src>

<mosaic_0001>
module attributes {stable_mosaic.version = 11 : i64} {
  func.func @autoencoder_kernel(%arg0: i32, %arg1: i32, %arg2: memref<8x128xf32, #tpu.memory_space<vmem>>, %arg3: memref<4x128x128xf32, #tpu.memory_space<vmem>>, %arg4: memref<8x128xf32, #tpu.memory_space<vmem>>, %arg5: memref<8x128xf32, #tpu.memory_space<vmem>>, %arg6: memref<8x128xf32, #tpu.memory_space<vmem>>, %arg7: memref<8x128xf32, #tpu.memory_space<vmem>>, %arg8: memref<8x128xf32, #tpu.memory_space<vmem>>, %arg9: memref<8x128xf32, #tpu.memory_space<vmem>>, %arg10: memref<8x128xf32, #tpu.memory_space<vmem>>, %arg11: memref<8x128xf32, #tpu.memory_space<vmem>>) attributes {dimension_semantics = [#tpu.dimension_semantics<arbitrary>, #tpu.dimension_semantics<arbitrary>], iteration_bounds = array<i64: 4, 1>, scalar_prefetch = 0 : i64, scratch_operands = 5 : i64, tpu.core_type = #tpu.core_type<tc>, window_params = [{transform_indices = @transform_0, window_bounds = array<i64: 8, 128>}, {pipeline_mode = #tpu.pipeline_mode<synchronous>, transform_indices = @transform_1, window_bounds = array<i64: 4, 128, 128>}, {pipeline_mode = #tpu.pipeline_mode<synchronous>, transform_indices = @transform_2, window_bounds = array<i64: 8, 128>}, {transform_indices = @transform_3, window_bounds = array<i64: 8, 128>}, {transform_indices = @transform_4, window_bounds = array<i64: 8, 128>}]} {
    %c8_i32 = arith.constant 8 : i32
    %0 = arith.muli %arg1, %c8_i32 : i32
    %1 = tpu.assume_multiple %0, 8 : i32
    %c0_i32 = arith.constant 0 : i32
    %2 = arith.cmpi eq, %arg0, %c0_i32 : i32
    %c0_i32_0 = arith.constant 0 : i32
    %3 = arith.cmpi eq, %arg1, %c0_i32_0 : i32
    %4 = arith.andi %2, %3 : i1
    %5 = arith.extui %4 : i1 to i32
    %c0_i32_1 = arith.constant 0 : i32
    %6 = arith.cmpi ne, %5, %c0_i32_1 : i32
    scf.if %6 {
      %cst = arith.constant 0.000000e+00 : f32
      %19 = vector.broadcast %cst : f32 to vector<8x128xf32>
      %c0 = arith.constant 0 : index
      %c0_7 = arith.constant 0 : index
      %20 = vector.load %arg11[%c0, %c0_7] : memref<8x128xf32, #tpu.memory_space<vmem>>, vector<8x128xf32>
      tpu.vector_store %arg11[%c0, %c0_7], %19 {strides = array<i32>} : memref<8x128xf32, #tpu.memory_space<vmem>>, vector<8x128xf32>,
    } else {
    }
    %c0_i32_2 = arith.constant 0 : i32
    %7 = arith.cmpi eq, %arg0, %c0_i32_2 : i32
    %8 = arith.extui %7 : i1 to i32
    %c0_i32_3 = arith.constant 0 : i32
    %9 = arith.cmpi ne, %8, %c0_i32_3 : i32
    scf.if %9 {
      %c0 = arith.constant 0 : index
      %c0_7 = arith.constant 0 : index
      %19 = vector.load %arg2[%c0, %c0_7] : memref<8x128xf32, #tpu.memory_space<vmem>>, vector<8x128xf32>
      %c0_8 = arith.constant 0 : index
      %c0_9 = arith.constant 0 : index
      %c0_10 = arith.constant 0 : index
      %20 = vector.load %arg3[%c0_8, %c0_9, %c0_10] : memref<4x128x128xf32, #tpu.memory_space<vmem>>, vector<1x128x128xf32>
      %21 = vector.shape_cast %20 : vector<1x128x128xf32> to vector<128x128xf32>
      %cst = arith.constant dense<0.000000e+00> : vector<8x128xf32>
      %22 = tpu.matmul %19, %21, %cst {dimension_numbers = #tpu.dot_dimension_numbers<[1], [0], [0], [1], [0, 0, 1, 1], [], []>} : vector<8x128xf32>, vector<128x128xf32>, vector<8x128xf32> -> vector<8x128xf32>
      %23 = arith.index_cast %1 : i32 to index
      %c0_11 = arith.constant 0 : index
      %24 = vector.load %arg7[%23, %c0_11] : memref<8x128xf32, #tpu.memory_space<vmem>>, vector<8x128xf32>
      tpu.vector_store %arg7[%23, %c0_11], %22 {strides = array<i32>} : memref<8x128xf32, #tpu.memory_space<vmem>>, vector<8x128xf32>,
      %c0_12 = arith.constant 0 : index
      %c0_13 = arith.constant 0 : index
      %25 = vector.load %arg11[%c0_12, %c0_13] : memref<8x128xf32, #tpu.memory_space<vmem>>, vector<1x128xf32>
      %cst_14 = arith.constant dense<0.000000e+00> : vector<128xf32>
      %26 = vector.multi_reduction <add>, %22, %cst_14 [0] : vector<8x128xf32> to vector<128xf32>
      %27 = vector.shape_cast %26 : vector<128xf32> to vector<1x128xf32>
      %28 = arith.addf %25, %27 : vector<1x128xf32>
      %c0_15 = arith.constant 0 : index
      %c0_16 = arith.constant 0 : index
      %29 = vector.load %arg11[%c0_15, %c0_16] : memref<8x128xf32, #tpu.memory_space<vmem>>, vector<1x128xf32>
      tpu.vector_store %arg11[%c0_15, %c0_16], %28 {strides = array<i32>} : memref<8x128xf32, #tpu.memory_space<vmem>>, vector<1x128xf32>,
      %c1 = arith.constant 1 : index
      %c0_17 = arith.constant 0 : index
      %30 = vector.load %arg11[%c1, %c0_17] : memref<8x128xf32, #tpu.memory_space<vmem>>, vector<1x128xf32>
      %31 = arith.mulf %22, %22 : vector<8x128xf32>
      %cst_18 = arith.constant dense<0.000000e+00> : vector<128xf32>
      %32 = vector.multi_reduction <add>, %31, %cst_18 [0] : vector<8x128xf32> to vector<128xf32>
      %33 = vector.shape_cast %32 : vector<128xf32> to vector<1x128xf32>
      %34 = arith.addf %30, %33 : vector<1x128xf32>
      %c1_19 = arith.constant 1 : index
      %c0_20 = arith.constant 0 : index
      %35 = vector.load %arg11[%c1_19, %c0_20] : memref<8x128xf32, #tpu.memory_space<vmem>>, vector<1x128xf32>
      tpu.vector_store %arg11[%c1_19, %c0_20], %34 {strides = array<i32>} : memref<8x128xf32, #tpu.memory_space<vmem>>, vector<1x128xf32>,
    } else {
    }
    %c1_i32 = arith.constant 1 : i32
    %10 = arith.cmpi eq, %arg0, %c1_i32 : i32
    %11 = arith.extui %10 : i1 to i32
    %c0_i32_4 = arith.constant 0 : i32
    %12 = arith.cmpi ne, %11, %c0_i32_4 : i32
    scf.if %12 {
      %c0 = arith.constant 0 : index
      %c0_7 = arith.constant 0 : index
      %19 = vector.load %arg11[%c0, %c0_7] : memref<8x128xf32, #tpu.memory_space<vmem>>, vector<1x128xf32>
      %c1 = arith.constant 1 : index
      %c0_8 = arith.constant 0 : index
      %20 = vector.load %arg11[%c1, %c0_8] : memref<8x128xf32, #tpu.memory_space<vmem>>, vector<1x128xf32>
      %cst = arith.constant 1.250000e-01 : f32
      %21 = vector.broadcast %cst : f32 to vector<1x128xf32>
      %22 = arith.mulf %19, %21 : vector<1x128xf32>
      %cst_9 = arith.constant 1.250000e-01 : f32
      %23 = vector.broadcast %cst_9 : f32 to vector<1x128xf32>
      %24 = arith.mulf %20, %23 : vector<1x128xf32>
      %25 = arith.mulf %22, %22 : vector<1x128xf32>
      %26 = arith.subf %24, %25 : vector<1x128xf32>
      %c0_10 = arith.constant 0 : index
      %c0_11 = arith.constant 0 : index
      %27 = vector.load %arg4[%c0_10, %c0_11] : memref<8x128xf32, #tpu.memory_space<vmem>>, vector<1x128xf32>
      %c3 = arith.constant 3 : index
      %c0_12 = arith.constant 0 : index
      %28 = vector.load %arg4[%c3, %c0_12] : memref<8x128xf32, #tpu.memory_space<vmem>>, vector<1x128xf32>
      %cst_13 = arith.constant 9.99999974E-6 : f32
      %29 = vector.broadcast %cst_13 : f32 to vector<1x128xf32>
      %30 = arith.addf %26, %29 : vector<1x128xf32>
      %31 = math.rsqrt %30 : vector<1x128xf32>
      %32 = arith.mulf %27, %31 : vector<1x128xf32>
      %33 = arith.mulf %22, %32 : vector<1x128xf32>
      %34 = arith.subf %28, %33 : vector<1x128xf32>
      %35 = arith.index_cast %1 : i32 to index
      %c0_14 = arith.constant 0 : index
      %36 = vector.load %arg7[%35, %c0_14] : memref<8x128xf32, #tpu.memory_space<vmem>>, vector<8x128xf32>
      %37 = vector.broadcast %32 : vector<1x128xf32> to vector<8x128xf32>
      %38 = arith.mulf %36, %37 : vector<8x128xf32>
      %39 = vector.broadcast %34 : vector<1x128xf32> to vector<8x128xf32>
      %40 = arith.addf %38, %39 : vector<8x128xf32>
      %cst_15 = arith.constant 0.000000e+00 : f32
      %41 = vector.broadcast %cst_15 : f32 to vector<8x128xf32>
      %42 = arith.maximumf %40, %41 : vector<8x128xf32>
      %c1_16 = arith.constant 1 : index
      %c0_17 = arith.constant 0 : index
      %c0_18 = arith.constant 0 : index
      %43 = vector.load %arg3[%c1_16, %c0_17, %c0_18] : memref<4x128x128xf32, #tpu.memory_space<vmem>>, vector<1x128x128xf32>
      %44 = vector.shape_cast %43 : vector<1x128x128xf32> to vector<128x128xf32>
      %cst_19 = arith.constant dense<0.000000e+00> : vector<8x128xf32>
      %45 = tpu.matmul %42, %44, %cst_19 {dimension_numbers = #tpu.dot_dimension_numbers<[1], [0], [0], [1], [0, 0, 1, 1], [], []>} : vector<8x128xf32>, vector<128x128xf32>, vector<8x128xf32> -> vector<8x128xf32>
      %46 = arith.index_cast %1 : i32 to index
      %c0_20 = arith.constant 0 : index
      %47 = vector.load %arg8[%46, %c0_20] : memref<8x128xf32, #tpu.memory_space<vmem>>, vector<8x128xf32>
      tpu.vector_store %arg8[%46, %c0_20], %45 {strides = array<i32>} : memref<8x128xf32, #tpu.memory_space<vmem>>, vector<8x128xf32>,
      %c2 = arith.constant 2 : index
      %c0_21 = arith.constant 0 : index
      %48 = vector.load %arg11[%c2, %c0_21] : memref<8x128xf32, #tpu.memory_space<vmem>>, vector<1x128xf32>
      %cst_22 = arith.constant dense<0.000000e+00> : vector<128xf32>
      %49 = vector.multi_reduction <add>, %45, %cst_22 [0] : vector<8x128xf32> to vector<128xf32>
      %50 = vector.shape_cast %49 : vector<128xf32> to vector<1x128xf32>
      %51 = arith.addf %48, %50 : vector<1x128xf32>
      %c2_23 = arith.constant 2 : index
      %c0_24 = arith.constant 0 : index
      %52 = vector.load %arg11[%c2_23, %c0_24] : memref<8x128xf32, #tpu.memory_space<vmem>>, vector<1x128xf32>
      tpu.vector_store %arg11[%c2_23, %c0_24], %51 {strides = array<i32>} : memref<8x128xf32, #tpu.memory_space<vmem>>, vector<1x128xf32>,
      %c3_25 = arith.constant 3 : index
      %c0_26 = arith.constant 0 : index
      %53 = vector.load %arg11[%c3_25, %c0_26] : memref<8x128xf32, #tpu.memory_space<vmem>>, vector<1x128xf32>
      %54 = arith.mulf %45, %45 : vector<8x128xf32>
      %cst_27 = arith.constant dense<0.000000e+00> : vector<128xf32>
      %55 = vector.multi_reduction <add>, %54, %cst_27 [0] : vector<8x128xf32> to vector<128xf32>
      %56 = vector.shape_cast %55 : vector<128xf32> to vector<1x128xf32>
      %57 = arith.addf %53, %56 : vector<1x128xf32>
      %c3_28 = arith.constant 3 : index
      %c0_29 = arith.constant 0 : index
      %58 = vector.load %arg11[%c3_28, %c0_29] : memref<8x128xf32, #tpu.memory_space<vmem>>, vector<1x128xf32>
      tpu.vector_store %arg11[%c3_28, %c0_29], %57 {strides = array<i32>} : memref<8x128xf32, #tpu.memory_space<vmem>>, vector<1x128xf32>,
    } else {
    }
    %c2_i32 = arith.constant 2 : i32
    %13 = arith.cmpi eq, %arg0, %c2_i32 : i32
    %14 = arith.extui %13 : i1 to i32
    %c0_i32_5 = arith.constant 0 : i32
    %15 = arith.cmpi ne, %14, %c0_i32_5 : i32
    scf.if %15 {
      %c2 = arith.constant 2 : index
      %c0 = arith.constant 0 : index
      %19 = vector.load %arg11[%c2, %c0] : memref<8x128xf32, #tpu.memory_space<vmem>>, vector<1x128xf32>
      %c3 = arith.constant 3 : index
      %c0_7 = arith.constant 0 : index
      %20 = vector.load %arg11[%c3, %c0_7] : memref<8x128xf32, #tpu.memory_space<vmem>>, vector<1x128xf32>
      %cst = arith.constant 1.250000e-01 : f32
      %21 = vector.broadcast %cst : f32 to vector<1x128xf32>
      %22 = arith.mulf %19, %21 : vector<1x128xf32>
      %cst_8 = arith.constant 1.250000e-01 : f32
      %23 = vector.broadcast %cst_8 : f32 to vector<1x128xf32>
      %24 = arith.mulf %20, %23 : vector<1x128xf32>
      %25 = arith.mulf %22, %22 : vector<1x128xf32>
      %26 = arith.subf %24, %25 : vector<1x128xf32>
      %c1 = arith.constant 1 : index
      %c0_9 = arith.constant 0 : index
      %27 = vector.load %arg4[%c1, %c0_9] : memref<8x128xf32, #tpu.memory_space<vmem>>, vector<1x128xf32>
      %c4 = arith.constant 4 : index
      %c0_10 = arith.constant 0 : index
      %28 = vector.load %arg4[%c4, %c0_10] : memref<8x128xf32, #tpu.memory_space<vmem>>, vector<1x128xf32>
      %cst_11 = arith.constant 9.99999974E-6 : f32
      %29 = vector.broadcast %cst_11 : f32 to vector<1x128xf32>
      %30 = arith.addf %26, %29 : vector<1x128xf32>
      %31 = math.rsqrt %30 : vector<1x128xf32>
      %32 = arith.mulf %27, %31 : vector<1x128xf32>
      %33 = arith.mulf %22, %32 : vector<1x128xf32>
      %34 = arith.subf %28, %33 : vector<1x128xf32>
      %35 = arith.index_cast %1 : i32 to index
      %c0_12 = arith.constant 0 : index
      %36 = vector.load %arg8[%35, %c0_12] : memref<8x128xf32, #tpu.memory_space<vmem>>, vector<8x128xf32>
      %37 = vector.broadcast %32 : vector<1x128xf32> to vector<8x128xf32>
      %38 = arith.mulf %36, %37 : vector<8x128xf32>
      %39 = vector.broadcast %34 : vector<1x128xf32> to vector<8x128xf32>
      %40 = arith.addf %38, %39 : vector<8x128xf32>
      %cst_13 = arith.constant 0.000000e+00 : f32
      %41 = vector.broadcast %cst_13 : f32 to vector<8x128xf32>
      %42 = arith.maximumf %40, %41 : vector<8x128xf32>
      %43 = arith.index_cast %1 : i32 to index
      %c0_14 = arith.constant 0 : index
      %44 = vector.load %arg10[%43, %c0_14] : memref<8x128xf32, #tpu.memory_space<vmem>>, vector<8x128xf32>
      tpu.vector_store %arg10[%43, %c0_14], %42 {strides = array<i32>} : memref<8x128xf32, #tpu.memory_space<vmem>>, vector<8x128xf32>,
      %c2_15 = arith.constant 2 : index
      %c0_16 = arith.constant 0 : index
      %c0_17 = arith.constant 0 : index
      %45 = vector.load %arg3[%c2_15, %c0_16, %c0_17] : memref<4x128x128xf32, #tpu.memory_space<vmem>>, vector<1x128x128xf32>
      %46 = vector.shape_cast %45 : vector<1x128x128xf32> to vector<128x128xf32>
      %cst_18 = arith.constant dense<0.000000e+00> : vector<8x128xf32>
      %47 = tpu.matmul %42, %46, %cst_18 {dimension_numbers = #tpu.dot_dimension_numbers<[1], [0], [0], [1], [0, 0, 1, 1], [], []>} : vector<8x128xf32>, vector<128x128xf32>, vector<8x128xf32> -> vector<8x128xf32>
      %48 = arith.index_cast %1 : i32 to index
      %c0_19 = arith.constant 0 : index
      %49 = vector.load %arg9[%48, %c0_19] : memref<8x128xf32, #tpu.memory_space<vmem>>, vector<8x128xf32>
      tpu.vector_store %arg9[%48, %c0_19], %47 {strides = array<i32>} : memref<8x128xf32, #tpu.memory_space<vmem>>, vector<8x128xf32>,
      %c4_20 = arith.constant 4 : index
      %c0_21 = arith.constant 0 : index
      %50 = vector.load %arg11[%c4_20, %c0_21] : memref<8x128xf32, #tpu.memory_space<vmem>>, vector<1x128xf32>
      %cst_22 = arith.constant dense<0.000000e+00> : vector<128xf32>
      %51 = vector.multi_reduction <add>, %47, %cst_22 [0] : vector<8x128xf32> to vector<128xf32>
      %52 = vector.shape_cast %51 : vector<128xf32> to vector<1x128xf32>
      %53 = arith.addf %50, %52 : vector<1x128xf32>
      %c4_23 = arith.constant 4 : index
      %c0_24 = arith.constant 0 : index
      %54 = vector.load %arg11[%c4_23, %c0_24] : memref<8x128xf32, #tpu.memory_space<vmem>>, vector<1x128xf32>
      tpu.vector_store %arg11[%c4_23, %c0_24], %53 {strides = array<i32>} : memref<8x128xf32, #tpu.memory_space<vmem>>, vector<1x128xf32>,
      %c5 = arith.constant 5 : index
      %c0_25 = arith.constant 0 : index
      %55 = vector.load %arg11[%c5, %c0_25] : memref<8x128xf32, #tpu.memory_space<vmem>>, vector<1x128xf32>
      %56 = arith.mulf %47, %47 : vector<8x128xf32>
      %cst_26 = arith.constant dense<0.000000e+00> : vector<128xf32>
      %57 = vector.multi_reduction <add>, %56, %cst_26 [0] : vector<8x128xf32> to vector<128xf32>
      %58 = vector.shape_cast %57 : vector<128xf32> to vector<1x128xf32>
      %59 = arith.addf %55, %58 : vector<1x128xf32>
      %c5_27 = arith.constant 5 : index
      %c0_28 = arith.constant 0 : index
      %60 = vector.load %arg11[%c5_27, %c0_28] : memref<8x128xf32, #tpu.memory_space<vmem>>, vector<1x128xf32>
      tpu.vector_store %arg11[%c5_27, %c0_28], %59 {strides = array<i32>} : memref<8x128xf32, #tpu.memory_space<vmem>>, vector<1x128xf32>,
    } else {
    }
    %c3_i32 = arith.constant 3 : i32
    %16 = arith.cmpi eq, %arg0, %c3_i32 : i32
    %17 = arith.extui %16 : i1 to i32
    %c0_i32_6 = arith.constant 0 : i32
    %18 = arith.cmpi ne, %17, %c0_i32_6 : i32
    scf.if %18 {
      %c4 = arith.constant 4 : index
      %c0 = arith.constant 0 : index
      %19 = vector.load %arg11[%c4, %c0] : memref<8x128xf32, #tpu.memory_space<vmem>>, vector<1x128xf32>
      %c5 = arith.constant 5 : index
      %c0_7 = arith.constant 0 : index
      %20 = vector.load %arg11[%c5, %c0_7] : memref<8x128xf32, #tpu.memory_space<vmem>>, vector<1x128xf32>
      %cst = arith.constant 1.250000e-01 : f32
      %21 = vector.broadcast %cst : f32 to vector<1x128xf32>
      %22 = arith.mulf %19, %21 : vector<1x128xf32>
      %cst_8 = arith.constant 1.250000e-01 : f32
      %23 = vector.broadcast %cst_8 : f32 to vector<1x128xf32>
      %24 = arith.mulf %20, %23 : vector<1x128xf32>
      %25 = arith.mulf %22, %22 : vector<1x128xf32>
      %26 = arith.subf %24, %25 : vector<1x128xf32>
      %c2 = arith.constant 2 : index
      %c0_9 = arith.constant 0 : index
      %27 = vector.load %arg4[%c2, %c0_9] : memref<8x128xf32, #tpu.memory_space<vmem>>, vector<1x128xf32>
      %c5_10 = arith.constant 5 : index
      %c0_11 = arith.constant 0 : index
      %28 = vector.load %arg4[%c5_10, %c0_11] : memref<8x128xf32, #tpu.memory_space<vmem>>, vector<1x128xf32>
      %cst_12 = arith.constant 9.99999974E-6 : f32
      %29 = vector.broadcast %cst_12 : f32 to vector<1x128xf32>
      %30 = arith.addf %26, %29 : vector<1x128xf32>
      %31 = math.rsqrt %30 : vector<1x128xf32>
      %32 = arith.mulf %27, %31 : vector<1x128xf32>
      %33 = arith.mulf %22, %32 : vector<1x128xf32>
      %34 = arith.subf %28, %33 : vector<1x128xf32>
      %35 = arith.index_cast %1 : i32 to index
      %c0_13 = arith.constant 0 : index
      %36 = vector.load %arg9[%35, %c0_13] : memref<8x128xf32, #tpu.memory_space<vmem>>, vector<8x128xf32>
      %37 = vector.broadcast %32 : vector<1x128xf32> to vector<8x128xf32>
      %38 = arith.mulf %36, %37 : vector<8x128xf32>
      %39 = vector.broadcast %34 : vector<1x128xf32> to vector<8x128xf32>
      %40 = arith.addf %38, %39 : vector<8x128xf32>
      %cst_14 = arith.constant 0.000000e+00 : f32
      %41 = vector.broadcast %cst_14 : f32 to vector<8x128xf32>
      %42 = arith.maximumf %40, %41 : vector<8x128xf32>
      %c3 = arith.constant 3 : index
      %c0_15 = arith.constant 0 : index
      %c0_16 = arith.constant 0 : index
      %43 = vector.load %arg3[%c3, %c0_15, %c0_16] : memref<4x128x128xf32, #tpu.memory_space<vmem>>, vector<1x128x128xf32>
      %44 = vector.shape_cast %43 : vector<1x128x128xf32> to vector<128x128xf32>
      %cst_17 = arith.constant dense<0.000000e+00> : vector<8x128xf32>
      %45 = tpu.matmul %42, %44, %cst_17 {dimension_numbers = #tpu.dot_dimension_numbers<[1], [0], [0], [1], [0, 0, 1, 1], [], []>} : vector<8x128xf32>, vector<128x128xf32>, vector<8x128xf32> -> vector<8x128xf32>
      %c6 = arith.constant 6 : index
      %c0_18 = arith.constant 0 : index
      %46 = vector.load %arg4[%c6, %c0_18] : memref<8x128xf32, #tpu.memory_space<vmem>>, vector<1x128xf32>
      %47 = vector.broadcast %46 : vector<1x128xf32> to vector<8x128xf32>
      %48 = arith.addf %45, %47 : vector<8x128xf32>
      %c0_19 = arith.constant 0 : index
      %c0_20 = arith.constant 0 : index
      %49 = vector.load %arg5[%c0_19, %c0_20] : memref<8x128xf32, #tpu.memory_space<vmem>>, vector<8x128xf32>
      tpu.vector_store %arg5[%c0_19, %c0_20], %48 {strides = array<i32>} : memref<8x128xf32, #tpu.memory_space<vmem>>, vector<8x128xf32>,
      %50 = arith.index_cast %1 : i32 to index
      %c0_21 = arith.constant 0 : index
      %51 = vector.load %arg10[%50, %c0_21] : memref<8x128xf32, #tpu.memory_space<vmem>>, vector<8x128xf32>
      %c0_22 = arith.constant 0 : index
      %c0_23 = arith.constant 0 : index
      %52 = vector.load %arg6[%c0_22, %c0_23] : memref<8x128xf32, #tpu.memory_space<vmem>>, vector<8x128xf32>
      tpu.vector_store %arg6[%c0_22, %c0_23], %51 {strides = array<i32>} : memref<8x128xf32, #tpu.memory_space<vmem>>, vector<8x128xf32>,
    } else {
    }
    return
  }
  func.func @transform_0(%arg0: i32, %arg1: i32) -> (i32, i32) {
    %c0_i32 = arith.constant 0 : i32
    %0 = arith.cmpi eq, %arg0, %c0_i32 : i32
    %c0_i32_0 = arith.constant 0 : i32
    %1 = arith.select %0, %arg1, %c0_i32_0 : i32
    %c0_i32_1 = arith.constant 0 : i32
    %c0_i32_2 = arith.constant 0 : i32
    return %1, %c0_i32_1 : i32, i32
  }
  func.func @transform_1(%arg0: i32, %arg1: i32) -> (i32, i32, i32) {
    %c0_i32 = arith.constant 0 : i32
    %c0_i32_0 = arith.constant 0 : i32
    %c0_i32_1 = arith.constant 0 : i32
    %c0_i32_2 = arith.constant 0 : i32
    return %c0_i32, %c0_i32_0, %c0_i32_1 : i32, i32, i32
  }
  func.func @transform_2(%arg0: i32, %arg1: i32) -> (i32, i32) {
    %c0_i32 = arith.constant 0 : i32
    %c0_i32_0 = arith.constant 0 : i32
    %c0_i32_1 = arith.constant 0 : i32
    return %c0_i32, %c0_i32_0 : i32, i32
  }
  func.func @transform_3(%arg0: i32, %arg1: i32) -> (i32, i32) {
    %c3_i32 = arith.constant 3 : i32
    %0 = arith.cmpi eq, %arg0, %c3_i32 : i32
    %c0_i32 = arith.constant 0 : i32
    %1 = arith.select %0, %arg1, %c0_i32 : i32
    %c0_i32_0 = arith.constant 0 : i32
    %c0_i32_1 = arith.constant 0 : i32
    return %1, %c0_i32_0 : i32, i32
  }
  func.func @transform_4(%arg0: i32, %arg1: i32) -> (i32, i32) {
    %c3_i32 = arith.constant 3 : i32
    %0 = arith.cmpi eq, %arg0, %c3_i32 : i32
    %c0_i32 = arith.constant 0 : i32
    %1 = arith.select %0, %arg1, %c0_i32 : i32
    %c0_i32_0 = arith.constant 0 : i32
    %c0_i32_1 = arith.constant 0 : i32
    return %1, %c0_i32_0 : i32, i32
  }
}

</mosaic_0001>

<bundles_post_ra>
// kernel: tpu_custom_call.1
= control target key start
LH: loop header
LB: loop body
LE: loop exit
PB: predicated region body
PF: predicated region fallthrough
CT: control target
= control target key end

     0   :  { %10 = vsyncpa [#allocation8], 0  ;;  %s1693_s0 = inlined_call_operand.hbm [shape: f32[8,128], index: 0, kind: input, shape index: {}]   ;;  %s1694_s1 = inlined_call_operand.hbm [shape: f32[4,128,128], index: 1, kind: input, shape index: {}]   ;;  %s1695_s2 = inlined_call_operand.hbm [shape: f32[8,128], index: 2, kind: input, shape index: {}]   ;;  %s1696_s3 = inlined_call_operand.hbm [shape: f32[8,128], index: 3, kind: output, shape index: {0}]   ;;  %s1697_s4 = inlined_call_operand.hbm [shape: f32[8,128], index: 4, kind: output, shape index: {1}]  }
   0x1   :  { %12 = vsyncpa [#allocation8 + $0x1], 0 }
   0x2   :  { %13 = vsyncpa [#allocation11], 0 }
   0x3   :  { %14 = vsyncpa [#allocation9], 0 }
   0x4   :  { %16 = vsyncpa [#allocation9 + $0x1], 0 }
   0x5   :  { %17 = vsyncpa [#allocation15], 0 }
   0x6   :  { %19 = vsyncpa [#allocation15 + $0x1], 0  ;;  %s1522_s15 = smov 0   ;;  %s1524_s16 = smov 0  }
   0x7   :  { %s1526_s17 = smov 0  }
   0x8 LB: > { %s987_s18 = sadd.s32 4294967295, %s1479_s17   ;;  %s988_s19 = sadd.s32 4294967294, %s1479_s17   ;;  %s1479_s17 = sphi %s1526_s17, %s25_s17   ;;  %s1475_s16 = sphi %s1524_s16, %s1704_s16   ;;  %s1471_s15 = sphi %s1522_s15, %s1703_s15  }
   0x9   : > { %s37_s20 = sadd.s32 1, %s1475_s16  ;;  %p989_p0 = scmp.ge.s32.totalorder %s1479_s17, 1 }
   0xa   : > { %p39_p1 = scmp.ge.s32.totalorder %s37_s20, 4  ;;  %p174_p2 = scmp.lt.s32.totalorder %s1479_s17, 5 }
   0xb   : > { %p1544_p3 = scmp.eq.s32.totalorder %s987_s18, 0  ;;  %s1481_s23 = smov [#allocation10]  }
   0xc   : > { %s1706_s20 = smov (%p39_p1, %s37_s20), 0  ;;  %p1550_p4 = pnand %p989_p0, %p174_p2 }
   0xd   : > { %s186_s24 = sshll.u32 %s1481_s23, 4  ;;  %p1259_p7 = scmp.lt.s32.totalorder %s1479_s17, 4  ;;  %s187_s24 = int_to_ptr.vmem [resolvable:$true] %s186_s24 }
   0xe   : > { %p1239_p5 = pneg %p1550_p4  ;;  %s1482_s26 = smov [#allocation12]  }
   0xf   : > { %s200_s27 = sshll.u32 %s1482_s26, 4  ;;  %s1326_s28 = scalar_lea.vmem %s187_s24, 8192  ;;  %s201_s27 = int_to_ptr.vmem [resolvable:$true] %s200_s27 }
  0x10   : > { %p1558_p6 = pnand %p1544_p3, %p1239_p5  ;;  %p1327_p9 = scmp.ne.s32.totalorder %s187_s24, %s1326_s28 }
  0x11   : > { %p1334_p12 = scmp.lt.s32.totalorder %s187_s24, %s187_s24  ;;  %p1335_p13 = scmp.lt.s32.totalorder %s1326_s28, %s1326_s28 }
  0x12   : > { %p1317_p8 = pneg %p1558_p6 }
  0x13   : > { %p1336_p0 = por %p1335_p13, %p1334_p12 }
  0x14   : > { %p1329_p10 = pnand %p1327_p9, %p1317_p8 }
  0x16   : > { %p1330_p11 = pneg %p1329_p10 }
  0x18   : > { %p1337_p1 = pnand %p1336_p0, %p1330_p11 }
  0x1a   : > { %1340 = shalt.err (!%p1337_p1)
}
  0x1b   : > { %s1483_s29 = smov 128   ;;  %s1484_s30 = smov 8  }
  0x1c   : > { %1242 = dma.hbm_to_vmem [thread:$0]  (!%p1558_p6), %s1694_s1, 8192, %s187_s24, [#allocation11], %s1483_s29, %s1483_s29, %s1484_s30  }
  0x1d   : > { %p1260_p2 = scmp.eq.s32.totalorder %s1479_s17, 0  ;;  %s1352_s7 = scalar_lea.vmem %s201_s27, 128 }
  0x1e   : > { %p1353_p5 = scmp.ne.s32.totalorder %s201_s27, %s1352_s7  ;;  %p1360_p11 = scmp.lt.s32.totalorder %s201_s27, %s201_s27 }
  0x1f   : > { %p1361_p12 = scmp.lt.s32.totalorder %s1352_s7, %s1352_s7 }
  0x20   : > { %p1355_p9 = pnand %p1353_p5, %p1317_p8 }
  0x21   : > { %p1362_p13 = por %p1361_p12, %p1360_p11 }
  0x22   : > { %p1356_p10 = pneg %p1355_p9 }
  0x24   : > { %p1363_p0 = pnand %p1362_p13, %p1356_p10 }
  0x26   : > { %1366 = shalt.err (!%p1363_p0)
}
  0x27   : > { %1245 = dma.hbm_to_vmem [thread:$0]  (!%p1558_p6), %s1695_s2, 128, %s201_s27, [#allocation11]  }
  0x28   : > { %p1584_p1 = pnand %p1260_p2, %p1259_p7  ;;  %s1485_s11 = smov [#allocation7]  }
  0x29   : > { %s224_s12 = sshll.u32 %s1485_s11, 4  ;;  %s225_s12 = int_to_ptr.vmem [resolvable:$true] %s224_s12 }
  0x2a   : > { %p1369_p8 = pneg %p1584_p1  ;;  %s1378_s13 = scalar_lea.vmem %s225_s12, 128 }
  0x2b   : > { %p1379_p5 = scmp.ne.s32.totalorder %s225_s12, %s1378_s13  ;;  %s1385_s14 = scalar_lea.vmem %s225_s12, 256 }
  0x2c   : > { %p1386_p11 = scmp.lt.s32.totalorder %s225_s12, %s225_s12  ;;  %p1387_p12 = scmp.lt.s32.totalorder %s1385_s14, %s1378_s13 }
  0x2d   : > { %p1381_p9 = pnand %p1379_p5, %p1369_p8 }
  0x2e   : > { %p1388_p13 = por %p1387_p12, %p1386_p11 }
  0x2f   : > { %p1382_p10 = pneg %p1381_p9 }
  0x31   : > { %p1389_p6 = pnand %p1388_p13, %p1382_p10 }
  0x33   : > { %1392 = shalt.err (!%p1389_p6)
}
  0x34   : > { %1249 = dma.hbm_to_vmem [thread:$0]  (!%p1584_p1), %s1693_s0, 128, %s225_s12, [#allocation8]  }
  0x35   : > { %233 = sbr.rel (%p1550_p4) target bundleno = 1087 (0x43f), region = 32 }
  0x3a   : > { %1454 = dma.done.wait (%p1544_p3), [#allocation8], 128  }
  0x3b   : > { %1456 = vsyncadd (%p1544_p3), [#allocation8], 4294967168 }
  0x3c   : > { %1458 = dma.done.wait (%p1544_p3), [#allocation11], 8320  }
  0x3d   : > { %1460 = vsyncadd (%p1544_p3), [#allocation11], 4294958976  ;;  %p284_p7 = scmp.eq.s32.totalorder %s1471_s15, 0 }
  0x3e   : > { %v1486_v0 = vmov (%p284_p7), 0.0  }
  0x3f   : > { %289 = sbr.rel (!%p284_p7) target bundleno = 68 (0x44), region = 48  ;;  %290 = vst [vmem:[#allocation6] sm:$0xff] (%p284_p7), %v1486_v0 }
  0x44 PF: > { %p999_p4 = scmp.ne.s32.totalorder %s1471_s15, 0 }
  0x46   : > { %293 = sbr.rel (%p999_p4) target bundleno = 318 (0x13e), region = 52 }
  0x4b   : > { %v310_v1 = vld [vmem:[#allocation10 + $0x78] sm:$0xff]  ;;  %v1487_v2 = vmov 0.0   ;;  %v309_v3 = vld [vmem:[#allocation10 + $0x70] sm:$0xff]  ;;  %vm1488_vm0 = vmmov 0   ;;  %v308_v4 = vld [vmem:[#allocation10 + $0x68] sm:$0xff] }
  0x4c   : > { %1079 = vmatprep.subr.mxu0 %v1487_v2  ;;  %1111 = vmatprep.mubr.msk.f32.mxu0 %vm1488_vm0, %v1487_v2  ;;  %v307_v5 = vld [vmem:[#allocation10 + $0x60] sm:$0xff]  ;;  %v306_v6 = vld [vmem:[#allocation10 + $0x58] sm:$0xff]  ;;  %v305_v7 = vld [vmem:[#allocation10 + $0x50] sm:$0xff] }
  0x4d   : > { %1080 = vmatpush3.msra.mxu0 %v310_v1  ;;  %v304_v8 = vld [vmem:[#allocation10 + $0x48] sm:$0xff]  ;;  %v303_v9 = vld [vmem:[#allocation10 + $0x40] sm:$0xff]  ;;  %v302_v10 = vld [vmem:[#allocation10 + $0x38] sm:$0xff] }
  0x4e   : > { %1081 = vmatprep.subr.mxu0 %v1487_v2  ;;  %v301_v11 = vld [vmem:[#allocation10 + $0x30] sm:$0xff]  ;;  %v300_v12 = vld [vmem:[#allocation10 + $0x28] sm:$0xff]  ;;  %v299_v13 = vld [vmem:[#allocation10 + $0x20] sm:$0xff] }
  0x4f   : > { %1082 = vmatpush3.msra.mxu0 %v309_v3  ;;  %v298_v14 = vld [vmem:[#allocation10 + $0x18] sm:$0xff]  ;;  %v297_v15 = vld [vmem:[#allocation10 + $0x10] sm:$0xff]  ;;  %v296_v16 = vld [vmem:[#allocation10 + $0x8] sm:$0xff] }
  0x50   : > { %1083 = vmatprep.subr.mxu0 %v1487_v2  ;;  %v295_v17 = vld [vmem:[#allocation10] sm:$0xff]  ;;  %v294_v18 = vld [vmem:[#allocation7] sm:$0xff]  ;;  %v383_v31 = vld [vmem:[#allocation6] sm:$0x1] }
  0x51   : > { %1084 = vmatpush3.msra.mxu0 %v308_v4  ;;  %v392_v34 = vld [vmem:[#allocation6 + $0x1] sm:$0x1] }
  0x52   : > { %1085 = vmatprep.subr.mxu0 %v1487_v2 }
  0x53   : > { %1086 = vmatpush3.msra.mxu0 %v307_v5 }
  0x54   : > { %1087 = vmatprep.subr.mxu0 %v1487_v2 }
  0x55   : > { %1088 = vmatpush3.msra.mxu0 %v306_v6 }
  0x56   : > { %1089 = vmatprep.subr.mxu0 %v1487_v2 }
  0x57   : > { %1090 = vmatpush3.msra.mxu0 %v305_v7 }
  0x58   : > { %1091 = vmatprep.subr.mxu0 %v1487_v2 }
  0x59   : > { %1092 = vmatpush3.msra.mxu0 %v304_v8 }
  0x5a   : > { %1093 = vmatprep.subr.mxu0 %v1487_v2 }
  0x5b   : > { %1094 = vmatpush3.msra.mxu0 %v303_v9 }
  0x5c   : > { %1095 = vmatprep.subr.mxu0 %v1487_v2 }
  0x5d   : > { %1096 = vmatpush3.msra.mxu0 %v302_v10 }
  0x5e   : > { %1097 = vmatprep.subr.mxu0 %v1487_v2 }
  0x5f   : > { %1098 = vmatpush3.msra.mxu0 %v301_v11 }
  0x60   : > { %1099 = vmatprep.subr.mxu0 %v1487_v2 }
  0x61   : > { %1100 = vmatpush3.msra.mxu0 %v300_v12 }
  0x62   : > { %1101 = vmatprep.subr.mxu0 %v1487_v2 }
  0x63   : > { %1102 = vmatpush3.msra.mxu0 %v299_v13 }
  0x64   : > { %1103 = vmatprep.subr.mxu0 %v1487_v2 }
  0x65   : > { %1104 = vmatpush3.msra.mxu0 %v298_v14 }
  0x66   : > { %1105 = vmatprep.subr.mxu0 %v1487_v2 }
  0x67   : > { %1106 = vmatpush3.msra.mxu0 %v297_v15 }
  0x68   : > { %1107 = vmatprep.subr.mxu0 %v1487_v2 }
  0x69   : > { %1108 = vmatpush3.msra.mxu0 %v296_v16 }
  0x6a   : > { %1109 = vmatprep.subr.mxu0 %v1487_v2 }
  0x6b   : > { %1110 = vmatpush3.msra.mxu0 %v295_v17 }
  0x6c   : > { %1112 = vmatmul.mubr.f32.vlgmr.msra.gmra.mxu0 %v294_v18 }
 0x12c   : > { %v377_v19 = vpop.f32.mrf.mxu0 }
 0x12d   : > { %382 = vst [vmem:[#allocation2] sm:$0xff] %v377_v19  ;;  %v384_v20 = vrot.slane %v377_v19, 4  ;;  %v393_v21 = vmul.f32 %v377_v19, %v377_v19 }
 0x12e   : > { %v1113_v22 = vpop.f32.mrf.mxu0 }
 0x12f   : > { %v385_v23 = vadd.f32 %v384_v20, %v377_v19  ;;  %v394_v24 = vrot.slane %v393_v21, 4 }
 0x131   : > { %v386_v25 = vrot.slane %v385_v23, 2  ;;  %v395_v26 = vadd.f32 %v394_v24, %v393_v21 }
 0x133   : > { %v387_v27 = vadd.f32 %v386_v25, %v385_v23  ;;  %v396_v28 = vrot.slane %v395_v26, 2 }
 0x135   : > { %v388_v29 = vrot.slane %v387_v27, 1  ;;  %v397_v30 = vadd.f32 %v396_v28, %v395_v26 }
 0x137   : > { %v389_v32 = vadd.f32 %v388_v29, %v387_v27  ;;  %v398_v33 = vrot.slane %v397_v30, 1 }
 0x139   : > { %v390_v35 = vadd.f32 %v389_v32, %v383_v31  ;;  %v399_v36 = vadd.f32 %v398_v33, %v397_v30 }
 0x13b   : > { %391 = vst [vmem:[#allocation6] sm:$0x1] %v390_v35  ;;  %v400_v37 = vadd.f32 %v399_v36, %v392_v34 }
 0x13d   : > { %401 = vst [vmem:[#allocation6 + $0x1] sm:$0x1] %v400_v37 }
 0x13e PF: > { %p1000_p3 = scmp.ne.s32.totalorder %s1471_s15, 1 }
 0x140   : > { %405 = sbr.rel (%p1000_p3) target bundleno = 571 (0x23b), region = 56 }
 0x145   : > { %v448_v38 = vld [vmem:[#allocation10 + $0xf8] sm:$0xff]  ;;  %v1489_v39 = vmov 0.0   ;;  %v447_v40 = vld [vmem:[#allocation10 + $0xf0] sm:$0xff]  ;;  %vm1490_vm1 = vmmov 0   ;;  %v446_v41 = vld [vmem:[#allocation10 + $0xe8] sm:$0xff]  ;;  %v421_v56 = vlaneseq }
 0x146   : > { %1114 = vmatprep.subr.mxu0 %v1489_v39  ;;  %1146 = vmatprep.mubr.msk.f32.mxu0 %vm1490_vm1, %v1489_v39  ;;  %v445_v42 = vld [vmem:[#allocation10 + $0xe0] sm:$0xff]  ;;  %v406_v43 = vld [vmem:[#allocation6] sm:$0x1]  ;;  %v407_v44 = vld [vmem:[#allocation6 + $0x1] sm:$0x1] }
 0x147   : > { %1115 = vmatpush3.msra.mxu0 %v448_v38  ;;  %v408_v45 = vmul.f32 0.125, %v406_v43  ;;  %v409_v46 = vmul.f32 0.125, %v407_v44  ;;  %v444_v47 = vld [vmem:[#allocation10 + $0xd8] sm:$0xff]  ;;  %v443_v49 = vld [vmem:[#allocation10 + $0xd0] sm:$0xff]  ;;  %v442_v51 = vld [vmem:[#allocation10 + $0xc8] sm:$0xff]  ;;  %v422_v59 = vshrl.u32 %v421_v56, 7 }
 0x148   : > { %1116 = vmatprep.subr.mxu0 %v1489_v39  ;;  %v441_v53 = vld [vmem:[#allocation10 + $0xc0] sm:$0xff]  ;;  %v440_v54 = vld [vmem:[#allocation10 + $0xb8] sm:$0xff]  ;;  %v439_v55 = vld [vmem:[#allocation10 + $0xb0] sm:$0xff] }
 0x149   : > { %1117 = vmatpush3.msra.mxu0 %v447_v40  ;;  %v410_v48 = vmul.f32 %v408_v45, %v408_v45  ;;  %v438_v57 = vld [vmem:[#allocation10 + $0xa8] sm:$0xff]  ;;  %v437_v58 = vld [vmem:[#allocation10 + $0xa0] sm:$0xff]  ;;  %v436_v60 = vld [vmem:[#allocation10 + $0x98] sm:$0xff]  ;;  %v423_v63 = vsub.s32 0, %v422_v59 }
 0x14a   : > { %1118 = vmatprep.subr.mxu0 %v1489_v39  ;;  %v435_v61 = vld [vmem:[#allocation10 + $0x90] sm:$0xff]  ;;  %v412_v62 = vld [vmem:[#allocation12] sm:$0x1]  ;;  %v434_v1 = vld [vmem:[#allocation10 + $0x88] sm:$0xff] }
 0x14b   : > { %1119 = vmatpush3.msra.mxu0 %v446_v41  ;;  %v411_v50 = vsub.f32 %v409_v46, %v410_v48  ;;  %v433_v3 = vld [vmem:[#allocation10 + $0x80] sm:$0xff]  ;;  %v420_v5 = vld [vmem:[#allocation2] sm:$0xff] }
 0x14c   : > { %1120 = vmatprep.subr.mxu0 %v1489_v39  ;;  %v413_v4 = vld [vmem:[#allocation12 + $0x3] sm:$0x1]  ;;  %v521_v25 = vld [vmem:[#allocation6 + $0x2] sm:$0x1]  ;;  %v530_v28 = vld [vmem:[#allocation6 + $0x3] sm:$0x1] }
 0x14d   : > { %1121 = vmatpush3.msra.mxu0 %v445_v42  ;;  %v414_v52 = vadd.f32 1e-05, %v411_v50 }
 0x14e   : > { %1122 = vmatprep.subr.mxu0 %v1489_v39 }
 0x14f   : > { %1123 = vmatpush3.msra.mxu0 %v444_v47  ;;  %1309 = vrsqrt.f32 %v414_v52 }
 0x150   : > { %1124 = vmatprep.subr.mxu0 %v1489_v39 }
 0x151   : > { %1125 = vmatpush3.msra.mxu0 %v443_v49 }
 0x152   : > { %1126 = vmatprep.subr.mxu0 %v1489_v39 }
 0x153   : > { %1127 = vmatpush3.msra.mxu0 %v442_v51 }
 0x154   : > { %1128 = vmatprep.subr.mxu0 %v1489_v39 }
 0x155   : > { %1129 = vmatpush3.msra.mxu0 %v441_v53 }
 0x156   : > { %1130 = vmatprep.subr.mxu0 %v1489_v39 }
 0x157   : > { %1131 = vmatpush3.msra.mxu0 %v440_v54 }
 0x158   : > { %1132 = vmatprep.subr.mxu0 %v1489_v39 }
 0x159   : > { %1133 = vmatpush3.msra.mxu0 %v439_v55 }
 0x15a   : > { %1134 = vmatprep.subr.mxu0 %v1489_v39 }
 0x15b   : > { %1135 = vmatpush3.msra.mxu0 %v438_v57 }
 0x15c   : > { %1136 = vmatprep.subr.mxu0 %v1489_v39  ;;  %v1310_v0 = vpop.eup %1309 }
 0x15d   : > { %1137 = vmatpush3.msra.mxu0 %v437_v58  ;;  %v416_v2 = vmul.f32 %v1310_v0, %v412_v62 }
 0x15e   : > { %1138 = vmatprep.subr.mxu0 %v1489_v39 }
 0x15f   : > { %1139 = vmatpush3.msra.mxu0 %v436_v60  ;;  %v417_v6 = vmul.f32 %v416_v2, %v408_v45  ;;  %v424_v7 = vrot.slane %v416_v2, %v423_v63 }
 0x160   : > { %1140 = vmatprep.subr.mxu0 %v1489_v39 }
 0x161   : > { %1141 = vmatpush3.msra.mxu0 %v435_v61  ;;  %v418_v8 = vsub.f32 %v413_v4, %v417_v6  ;;  %v425_v9 = vmul.f32 %v424_v7, %v420_v5 }
 0x162   : > { %1142 = vmatprep.subr.mxu0 %v1489_v39 }
 0x163   : > { %1143 = vmatpush3.msra.mxu0 %v434_v1  ;;  %v429_v10 = vrot.slane %v418_v8, %v423_v63 }
 0x164   : > { %1144 = vmatprep.subr.mxu0 %v1489_v39 }
 0x165   : > { %1145 = vmatpush3.msra.mxu0 %v433_v3  ;;  %v430_v11 = vadd.f32 %v429_v10, %v425_v9 }
 0x167   : > { %v431_v12 = vmax.f32 %v430_v11, 0.0 }
 0x169   : > { %1147 = vmatmul.mubr.f32.vlgmr.msra.gmra.mxu0 %v431_v12 }
 0x229   : > { %v515_v13 = vpop.f32.mrf.mxu0 }
 0x22a   : > { %520 = vst [vmem:[#allocation3] sm:$0xff] %v515_v13  ;;  %v522_v14 = vrot.slane %v515_v13, 4  ;;  %v531_v15 = vmul.f32 %v515_v13, %v515_v13 }
 0x22b   : > { %v1148_v16 = vpop.f32.mrf.mxu0 }
 0x22c   : > { %v523_v17 = vadd.f32 %v522_v14, %v515_v13  ;;  %v532_v18 = vrot.slane %v531_v15, 4 }
 0x22e   : > { %v524_v19 = vrot.slane %v523_v17, 2  ;;  %v533_v20 = vadd.f32 %v532_v18, %v531_v15 }
 0x230   : > { %v525_v21 = vadd.f32 %v524_v19, %v523_v17  ;;  %v534_v22 = vrot.slane %v533_v20, 2 }
 0x232   : > { %v526_v23 = vrot.slane %v525_v21, 1  ;;  %v535_v24 = vadd.f32 %v534_v22, %v533_v20 }
 0x234   : > { %v527_v26 = vadd.f32 %v526_v23, %v525_v21  ;;  %v536_v27 = vrot.slane %v535_v24, 1 }
 0x236   : > { %v528_v29 = vadd.f32 %v527_v26, %v521_v25  ;;  %v537_v30 = vadd.f32 %v536_v27, %v535_v24 }
 0x238   : > { %529 = vst [vmem:[#allocation6 + $0x2] sm:$0x1] %v528_v29  ;;  %v538_v31 = vadd.f32 %v537_v30, %v530_v28 }
 0x23a   : > { %539 = vst [vmem:[#allocation6 + $0x3] sm:$0x1] %v538_v31 }
 0x23b PF: > { %p1001_p2 = scmp.ne.s32.totalorder %s1471_s15, 2 }
 0x23d   : > { %543 = sbr.rel (%p1001_p2) target bundleno = 824 (0x338), region = 60 }
 0x242   : > { %v588_v32 = vld [vmem:[#allocation10 + $0x178] sm:$0xff]  ;;  %v1491_v33 = vmov 0.0   ;;  %v587_v34 = vld [vmem:[#allocation10 + $0x170] sm:$0xff]  ;;  %vm1492_vm2 = vmmov 0   ;;  %v586_v35 = vld [vmem:[#allocation10 + $0x168] sm:$0xff]  ;;  %v559_v50 = vlaneseq }
 0x243   : > { %1149 = vmatprep.subr.mxu0 %v1491_v33  ;;  %1181 = vmatprep.mubr.msk.f32.mxu0 %vm1492_vm2, %v1491_v33  ;;  %v585_v36 = vld [vmem:[#allocation10 + $0x160] sm:$0xff]  ;;  %v544_v37 = vld [vmem:[#allocation6 + $0x2] sm:$0x1]  ;;  %v545_v38 = vld [vmem:[#allocation6 + $0x3] sm:$0x1] }
 0x244   : > { %1150 = vmatpush3.msra.mxu0 %v588_v32  ;;  %v546_v39 = vmul.f32 0.125, %v544_v37  ;;  %v547_v40 = vmul.f32 0.125, %v545_v38  ;;  %v584_v41 = vld [vmem:[#allocation10 + $0x158] sm:$0xff]  ;;  %v583_v43 = vld [vmem:[#allocation10 + $0x150] sm:$0xff]  ;;  %v582_v45 = vld [vmem:[#allocation10 + $0x148] sm:$0xff]  ;;  %v560_v53 = vshrl.u32 %v559_v50, 7 }
 0x245   : > { %1151 = vmatprep.subr.mxu0 %v1491_v33  ;;  %v581_v47 = vld [vmem:[#allocation10 + $0x140] sm:$0xff]  ;;  %v580_v48 = vld [vmem:[#allocation10 + $0x138] sm:$0xff]  ;;  %v579_v49 = vld [vmem:[#allocation10 + $0x130] sm:$0xff] }
 0x246   : > { %1152 = vmatpush3.msra.mxu0 %v587_v34  ;;  %v548_v42 = vmul.f32 %v546_v39, %v546_v39  ;;  %v578_v51 = vld [vmem:[#allocation10 + $0x128] sm:$0xff]  ;;  %v577_v52 = vld [vmem:[#allocation10 + $0x120] sm:$0xff]  ;;  %v576_v54 = vld [vmem:[#allocation10 + $0x118] sm:$0xff]  ;;  %v561_v57 = vsub.s32 0, %v560_v53 }
 0x247   : > { %1153 = vmatprep.subr.mxu0 %v1491_v33  ;;  %v575_v55 = vld [vmem:[#allocation10 + $0x110] sm:$0xff]  ;;  %v550_v56 = vld [vmem:[#allocation12 + $0x1] sm:$0x1]  ;;  %v574_v59 = vld [vmem:[#allocation10 + $0x108] sm:$0xff] }
 0x248   : > { %1154 = vmatpush3.msra.mxu0 %v586_v35  ;;  %v549_v44 = vsub.f32 %v547_v40, %v548_v42  ;;  %v573_v61 = vld [vmem:[#allocation10 + $0x100] sm:$0xff]  ;;  %v558_v63 = vld [vmem:[#allocation3] sm:$0xff]  ;;  %v661_v19 = vld [vmem:[#allocation6 + $0x4] sm:$0x1] }
 0x249   : > { %1155 = vmatprep.subr.mxu0 %v1491_v33  ;;  %v551_v62 = vld [vmem:[#allocation12 + $0x4] sm:$0x1]  ;;  %v670_v22 = vld [vmem:[#allocation6 + $0x5] sm:$0x1] }
 0x24a   : > { %1156 = vmatpush3.msra.mxu0 %v585_v36  ;;  %v552_v46 = vadd.f32 1e-05, %v549_v44 }
 0x24b   : > { %1157 = vmatprep.subr.mxu0 %v1491_v33 }
 0x24c   : > { %1158 = vmatpush3.msra.mxu0 %v584_v41  ;;  %1311 = vrsqrt.f32 %v552_v46 }
 0x24d   : > { %1159 = vmatprep.subr.mxu0 %v1491_v33 }
 0x24e   : > { %1160 = vmatpush3.msra.mxu0 %v583_v43 }
 0x24f   : > { %1161 = vmatprep.subr.mxu0 %v1491_v33 }
 0x250   : > { %1162 = vmatpush3.msra.mxu0 %v582_v45 }
 0x251   : > { %1163 = vmatprep.subr.mxu0 %v1491_v33 }
 0x252   : > { %1164 = vmatpush3.msra.mxu0 %v581_v47 }
 0x253   : > { %1165 = vmatprep.subr.mxu0 %v1491_v33 }
 0x254   : > { %1166 = vmatpush3.msra.mxu0 %v580_v48 }
 0x255   : > { %1167 = vmatprep.subr.mxu0 %v1491_v33 }
 0x256   : > { %1168 = vmatpush3.msra.mxu0 %v579_v49 }
 0x257   : > { %1169 = vmatprep.subr.mxu0 %v1491_v33 }
 0x258   : > { %1170 = vmatpush3.msra.mxu0 %v578_v51 }
 0x259   : > { %1171 = vmatprep.subr.mxu0 %v1491_v33  ;;  %v1312_v58 = vpop.eup %1311 }
 0x25a   : > { %1172 = vmatpush3.msra.mxu0 %v577_v52  ;;  %v554_v60 = vmul.f32 %v1312_v58, %v550_v56 }
 0x25b   : > { %1173 = vmatprep.subr.mxu0 %v1491_v33 }
 0x25c   : > { %1174 = vmatpush3.msra.mxu0 %v576_v54  ;;  %v555_v0 = vmul.f32 %v554_v60, %v546_v39  ;;  %v562_v1 = vrot.slane %v554_v60, %v561_v57 }
 0x25d   : > { %1175 = vmatprep.subr.mxu0 %v1491_v33 }
 0x25e   : > { %1176 = vmatpush3.msra.mxu0 %v575_v55  ;;  %v556_v2 = vsub.f32 %v551_v62, %v555_v0  ;;  %v563_v3 = vmul.f32 %v562_v1, %v558_v63 }
 0x25f   : > { %1177 = vmatprep.subr.mxu0 %v1491_v33 }
 0x260   : > { %1178 = vmatpush3.msra.mxu0 %v574_v59  ;;  %v567_v4 = vrot.slane %v556_v2, %v561_v57 }
 0x261   : > { %1179 = vmatprep.subr.mxu0 %v1491_v33 }
 0x262   : > { %1180 = vmatpush3.msra.mxu0 %v573_v61  ;;  %v568_v5 = vadd.f32 %v567_v4, %v563_v3 }
 0x264   : > { %v569_v6 = vmax.f32 %v568_v5, 0.0 }
 0x266   : > { %571 = vst [vmem:[#allocation5] sm:$0xff] %v569_v6  ;;  %1182 = vmatmul.mubr.f32.vlgmr.msra.gmra.mxu0 %v569_v6 }
 0x326   : > { %v655_v7 = vpop.f32.mrf.mxu0 }
 0x327   : > { %660 = vst [vmem:[#allocation4] sm:$0xff] %v655_v7  ;;  %v662_v8 = vrot.slane %v655_v7, 4  ;;  %v671_v9 = vmul.f32 %v655_v7, %v655_v7 }
 0x328   : > { %v1183_v10 = vpop.f32.mrf.mxu0 }
 0x329   : > { %v663_v11 = vadd.f32 %v662_v8, %v655_v7  ;;  %v672_v12 = vrot.slane %v671_v9, 4 }
 0x32b   : > { %v664_v13 = vrot.slane %v663_v11, 2  ;;  %v673_v14 = vadd.f32 %v672_v12, %v671_v9 }
 0x32d   : > { %v665_v15 = vadd.f32 %v664_v13, %v663_v11  ;;  %v674_v16 = vrot.slane %v673_v14, 2 }
 0x32f   : > { %v666_v17 = vrot.slane %v665_v15, 1  ;;  %v675_v18 = vadd.f32 %v674_v16, %v673_v14 }
 0x331   : > { %v667_v20 = vadd.f32 %v666_v17, %v665_v15  ;;  %v676_v21 = vrot.slane %v675_v18, 1 }
 0x333   : > { %v668_v23 = vadd.f32 %v667_v20, %v661_v19  ;;  %v677_v24 = vadd.f32 %v676_v21, %v675_v18 }
 0x335   : > { %669 = vst [vmem:[#allocation6 + $0x4] sm:$0x1] %v668_v23  ;;  %v678_v25 = vadd.f32 %v677_v24, %v670_v22 }
 0x337   : > { %679 = vst [vmem:[#allocation6 + $0x5] sm:$0x1] %v678_v25 }
 0x338 PF: > { %p1002_p0 = scmp.ne.s32.totalorder %s1471_s15, 3 }
 0x33a   : > { %683 = sbr.rel (%p1002_p0) target bundleno = 1063 (0x427), region = 64 }
 0x33f   : > { %v726_v26 = vld [vmem:[#allocation10 + $0x1f8] sm:$0xff]  ;;  %v1493_v27 = vmov 0.0   ;;  %v725_v28 = vld [vmem:[#allocation10 + $0x1f0] sm:$0xff]  ;;  %vm1494_vm3 = vmmov 0   ;;  %v724_v29 = vld [vmem:[#allocation10 + $0x1e8] sm:$0xff]  ;;  %v699_v44 = vlaneseq }
 0x340   : > { %1184 = vmatprep.subr.mxu0 %v1493_v27  ;;  %1216 = vmatprep.mubr.msk.f32.mxu0 %vm1494_vm3, %v1493_v27  ;;  %v723_v30 = vld [vmem:[#allocation10 + $0x1e0] sm:$0xff]  ;;  %v684_v31 = vld [vmem:[#allocation6 + $0x4] sm:$0x1]  ;;  %v685_v32 = vld [vmem:[#allocation6 + $0x5] sm:$0x1] }
 0x341   : > { %1185 = vmatpush3.msra.mxu0 %v726_v26  ;;  %v686_v33 = vmul.f32 0.125, %v684_v31  ;;  %v687_v34 = vmul.f32 0.125, %v685_v32  ;;  %v722_v35 = vld [vmem:[#allocation10 + $0x1d8] sm:$0xff]  ;;  %v721_v37 = vld [vmem:[#allocation10 + $0x1d0] sm:$0xff]  ;;  %v720_v39 = vld [vmem:[#allocation10 + $0x1c8] sm:$0xff]  ;;  %v700_v47 = vshrl.u32 %v699_v44, 7 }
 0x342   : > { %1186 = vmatprep.subr.mxu0 %v1493_v27  ;;  %v719_v41 = vld [vmem:[#allocation10 + $0x1c0] sm:$0xff]  ;;  %v718_v42 = vld [vmem:[#allocation10 + $0x1b8] sm:$0xff]  ;;  %v717_v43 = vld [vmem:[#allocation10 + $0x1b0] sm:$0xff] }
 0x343   : > { %1187 = vmatpush3.msra.mxu0 %v725_v28  ;;  %v688_v36 = vmul.f32 %v686_v33, %v686_v33  ;;  %v716_v45 = vld [vmem:[#allocation10 + $0x1a8] sm:$0xff]  ;;  %v715_v46 = vld [vmem:[#allocation10 + $0x1a0] sm:$0xff]  ;;  %v714_v48 = vld [vmem:[#allocation10 + $0x198] sm:$0xff]  ;;  %v701_v51 = vsub.s32 0, %v700_v47 }
 0x344   : > { %1188 = vmatprep.subr.mxu0 %v1493_v27  ;;  %v713_v49 = vld [vmem:[#allocation10 + $0x190] sm:$0xff]  ;;  %v690_v50 = vld [vmem:[#allocation12 + $0x2] sm:$0x1]  ;;  %v712_v53 = vld [vmem:[#allocation10 + $0x188] sm:$0xff] }
 0x345   : > { %1189 = vmatpush3.msra.mxu0 %v724_v29  ;;  %v689_v38 = vsub.f32 %v687_v34, %v688_v36  ;;  %v711_v55 = vld [vmem:[#allocation10 + $0x180] sm:$0xff]  ;;  %v698_v57 = vld [vmem:[#allocation4] sm:$0xff] }
 0x346   : > { %1190 = vmatprep.subr.mxu0 %v1493_v27  ;;  %v691_v56 = vld [vmem:[#allocation12 + $0x5] sm:$0x1]  ;;  %v1003_v2 = vld [vmem:[#allocation12 + $0x6] ss:$0 sm:$0xff] }
 0x347   : > { %1191 = vmatpush3.msra.mxu0 %v723_v30  ;;  %v692_v40 = vadd.f32 1e-05, %v689_v38  ;;  %v804_v1 = vld [vmem:[#allocation5] sm:$0xff] }
 0x348   : > { %1192 = vmatprep.subr.mxu0 %v1493_v27  ;;  %805 = vst [vmem:[#allocation14] sm:$0xff] %v804_v1 }
 0x349   : > { %1193 = vmatpush3.msra.mxu0 %v722_v35  ;;  %1313 = vrsqrt.f32 %v692_v40 }
 0x34a   : > { %1194 = vmatprep.subr.mxu0 %v1493_v27 }
 0x34b   : > { %1195 = vmatpush3.msra.mxu0 %v721_v37 }
 0x34c   : > { %1196 = vmatprep.subr.mxu0 %v1493_v27 }
 0x34d   : > { %1197 = vmatpush3.msra.mxu0 %v720_v39 }
 0x34e   : > { %1198 = vmatprep.subr.mxu0 %v1493_v27 }
 0x34f   : > { %1199 = vmatpush3.msra.mxu0 %v719_v41 }
 0x350   : > { %1200 = vmatprep.subr.mxu0 %v1493_v27 }
 0x351   : > { %1201 = vmatpush3.msra.mxu0 %v718_v42 }
 0x352   : > { %1202 = vmatprep.subr.mxu0 %v1493_v27 }
 0x353   : > { %1203 = vmatpush3.msra.mxu0 %v717_v43 }
 0x354   : > { %1204 = vmatprep.subr.mxu0 %v1493_v27 }
 0x355   : > { %1205 = vmatpush3.msra.mxu0 %v716_v45 }
 0x356   : > { %1206 = vmatprep.subr.mxu0 %v1493_v27  ;;  %v1314_v52 = vpop.eup %1313 }
 0x357   : > { %1207 = vmatpush3.msra.mxu0 %v715_v46  ;;  %v694_v54 = vmul.f32 %v1314_v52, %v690_v50 }
 0x358   : > { %1208 = vmatprep.subr.mxu0 %v1493_v27 }
 0x359   : > { %1209 = vmatpush3.msra.mxu0 %v714_v48  ;;  %v695_v58 = vmul.f32 %v694_v54, %v686_v33  ;;  %v702_v59 = vrot.slane %v694_v54, %v701_v51 }
 0x35a   : > { %1210 = vmatprep.subr.mxu0 %v1493_v27 }
 0x35b   : > { %1211 = vmatpush3.msra.mxu0 %v713_v49  ;;  %v696_v60 = vsub.f32 %v691_v56, %v695_v58  ;;  %v703_v61 = vmul.f32 %v702_v59, %v698_v57 }
 0x35c   : > { %1212 = vmatprep.subr.mxu0 %v1493_v27 }
 0x35d   : > { %1213 = vmatpush3.msra.mxu0 %v712_v53  ;;  %v707_v62 = vrot.slane %v696_v60, %v701_v51 }
 0x35e   : > { %1214 = vmatprep.subr.mxu0 %v1493_v27 }
 0x35f   : > { %1215 = vmatpush3.msra.mxu0 %v711_v55  ;;  %v708_v63 = vadd.f32 %v707_v62, %v703_v61 }
 0x361   : > { %v709_v0 = vmax.f32 %v708_v63, 0.0 }
 0x363   : > { %1217 = vmatmul.mubr.f32.vlgmr.msra.gmra.mxu0 %v709_v0 }
 0x423   : > { %v798_v3 = vpop.f32.mrf.mxu0 }
 0x424   : > { %v799_v4 = vadd.f32 %v1003_v2, %v798_v3 }
 0x425   : > { %v1218_v5 = vpop.f32.mrf.mxu0 }
 0x426   : > { %802 = vst [vmem:[#allocation13] sm:$0xff] %v799_v4 }
 0x427 PF: > { %p1663_p1 = scmp.eq.s32.totalorder %s987_s18, 3  ;;  %s1495_s21 = smov [#allocation13]  }
 0x428   : > { %s827_s22 = sshll.u32 %s1495_s21, 4  ;;  %s1496_s25 = smov [#allocation14]   ;;  %s828_s22 = int_to_ptr.vmem [resolvable:$true] %s827_s22 }
 0x429   : > { %s842_s26 = sshll.u32 %s1496_s25, 4  ;;  %s1393_s27 = scalar_lea.vmem %s828_s22, 128  ;;  %s843_s26 = int_to_ptr.vmem [resolvable:$true] %s842_s26 }
 0x42a   : > { %p1394_p8 = scmp.ne.s32.totalorder %s828_s22, %s1393_s27  ;;  %s1399_s28 = scalar_lea.vmem %s828_s22, 256 }
 0x42b   : > { %p1400_p10 = scmp.lt.s32.totalorder %s828_s22, %s828_s22  ;;  %p1401_p11 = scmp.lt.s32.totalorder %s1399_s28, %s1393_s27 }
 0x42c   : > { %p1395_p5 = pnand %p1394_p8, %p1663_p1 }
 0x42d   : > { %p1402_p12 = por %p1401_p11, %p1400_p10 }
 0x42e   : > { %p1396_p9 = pneg %p1395_p5 }
 0x430   : > { %p1403_p13 = pnand %p1402_p12, %p1396_p9 }
 0x432   : > { %1406 = shalt.err (!%p1403_p13)
}
 0x433   : > { %1232 = dma.vmem_to_hbm [thread:$0]  (%p1663_p1), %s828_s22, 128, %s1696_s3, [#allocation9]  }
 0x434   : > { %s1417_s30 = scalar_lea.vmem %s843_s26, 128  ;;  %s1423_s5 = scalar_lea.vmem %s843_s26, 256 }
 0x435   : > { %p1418_p6 = scmp.ne.s32.totalorder %s843_s26, %s1417_s30  ;;  %p1424_p3 = scmp.lt.s32.totalorder %s843_s26, %s843_s26 }
 0x436   : > { %p1425_p2 = scmp.lt.s32.totalorder %s1423_s5, %s1417_s30 }
 0x437   : > { %p1419_p7 = pnand %p1418_p6, %p1663_p1 }
 0x438   : > { %p1426_p0 = por %p1425_p2, %p1424_p3 }
 0x439   : > { %p1420_p4 = pneg %p1419_p7 }
 0x43b   : > { %p1427_p8 = pnand %p1426_p0, %p1420_p4 }
 0x43d   : > { %1430 = shalt.err (!%p1427_p8)
}
 0x43e   : > { %1234 = dma.vmem_to_hbm [thread:$0]  (%p1663_p1), %s843_s26, 128, %s1697_s4, [#allocation15]  }
 0x43f PF: > { %p1266_p5 = scmp.ge.s32.totalorder %s1479_s17, 2  ;;  %p1267_p9 = scmp.eq.s32.totalorder %s988_s19, 3 }
 0x441   : > { %p1251_p10 = pnand %p1267_p9, %p1266_p5 }
 0x443   : > { %p1252_p11 = pneg %p1251_p10 }
 0x445   : > { %1462 = dma.done.wait (%p1252_p11), [#allocation9], 128  }
 0x446   : > { %1464 = vsyncadd (%p1252_p11), [#allocation9], 4294967168 }
 0x447   : > { %1466 = dma.done.wait (%p1252_p11), [#allocation15], 128  }
 0x448   : > { %1468 = vsyncadd (%p1252_p11), [#allocation15], 4294967168  ;;  %s25_s17 = sadd.s32 1, %s1479_s17   ;;  %s1703_s15 = smov %s1475_s16 }
 0x449   : > { %p22_p12 = scmp.ge.s32.totalorder %s25_s17, 6   ;;  %s1704_s16 = smov %s1706_s20 }
 0x44b   :  { %24 = sbr.rel (!%p22_p12) target bundleno = 8 (0x8), region = 133 }
 0x450   :  { %869 = vsyncpa [#allocation8], 1 }
 0x451   :  { %871 = vsyncpa [#allocation8 + $0x1], 1 }
 0x452   :  { %872 = vsyncpa [#allocation11], 1 }
 0x453   :  { %873 = vsyncpa [#allocation9], 1 }
 0x454   :  { %875 = vsyncpa [#allocation9 + $0x1], 1 }
 0x455   :  { %876 = vsyncpa [#allocation15], 1 }
 0x456   :  { %878 = vsyncpa [#allocation15 + $0x1], 1 }

</bundles_post_ra>
